<compile_context>
chip_gen: v7x
topology: tpu7x:2x2x1
jax: 0.10.0
libtpu: 0.0.40
codegen_flags: <defaults>
</compile_context>

<pallas_src>
import functools

import numpy as np
import jax
import jax.numpy as jnp
from jax.experimental import pallas as pl
from jax.experimental.pallas import tpu as pltpu

NEG_SLOPE = 0.3               # nn.LeakyReLU(negative_slope=0.3)
K = 7                         # all fused layers use 7 taps (1x5 zero-embedded)
PAD = (K - 1) // 2            # 'same' padding / halo width
CIN0_PAD = 8                  # I/O channel slab rows (2 real channels -> 8 sublanes)
COUT_MAX = 32                 # widest fused layer output (branch fusion: 16+16)
KC_MAX = K * COUT_MAX         # 224: deepest im2col contraction (layer 3)
PATCH_ROWS = KC_MAX + 16      # im2col scratch rows (taps + 16-row bias/mask block)
W_COLS = 256                  # weight lane dim (taps + bias column, padded to 2 vregs)
BYTES_PER_LANE = 1280         # per-lane VMEM working-set estimate (see _pick_tiling)

# fused layers: (real Cin, real Cout, LeakyReLU afterwards)
FUSED_LAYERS = ((2, 16, True), (16, 32, True), (32, 4, True), (4, 2, False))


def _ceil8(n):
    return ((n + 7) // 8) * 8


# static per-layer meta: (Cin padded, Cout padded, 7*Cin_pad, apply LeakyReLU)
LAYER_META = tuple((_ceil8(ci), _ceil8(co), K * _ceil8(ci), act)
                   for ci, co, act in FUSED_LAYERS)


def _lrelu(v):
    return jnp.where(v >= 0, v, NEG_SLOPE * v)


# --------------------------------- kernel ---------------------------------

def _refine_kernel(x_ref, w_ref, o_ref, patch_ref, *, wp, w_valid, roll_sign):
    """Whole RefineNet forward on one row tile.

    x_ref / o_ref: (8, L) f32 -- rows = channels (2 real + 6 zero), lanes = image
        rows laid out as wp-lane chunks [PAD halo | W data | right pad], halos 0.
    w_ref: (4, 32, 256) bf16 -- per fused layer, rows = output channels, column
        k*Cin_pad + ci = folded conv tap, column 7*Cin_pad = folded bias.
    patch_ref: (240, L) bf16 VMEM scratch -- im2col patch, reused by all layers.
    """
    L = x_ref.shape[-1]
    x = x_ref[...]

    # Valid-lane mask (1 on the W data lanes of each wp-chunk); wp is a power of
    # two so position-in-chunk is a lane AND.  Computed once per tile.
    col = jax.lax.broadcasted_iota(jnp.int32, (COUT_MAX, L), 1) & (wp - 1)
    mask = ((col >= PAD) & (col < PAD + w_valid)).astype(jnp.float32)     # (32, L)

    def tap(v, k):
        # tap k of the 'same' conv: out[:, p] = v[:, p + (k - PAD)].  Rolls stay
        # inside each wp-chunk for valid lanes; halo lanes pick up garbage that
        # the post-matmul mask multiply re-zeroes (load-bearing!).
        if k == PAD:
            return v
        return pltpu.roll(v, (roll_sign * (PAD - k)) % L, axis=1)

    h = x                                                                 # (8, L)
    for layer, (cin_p, cout_p, kc, act) in enumerate(LAYER_META):
        # --- im2col patch into the bf16 scratch, full-(16,128)-tile stores ---
        nb = 8 if cin_p == 8 else 16          # rows of the appended bias/mask block
        kcb = kc + nb                         # contraction depth incl. bias rows
        if cin_p == 8:
            # 7 taps + 8 mask rows -> four 16-row stores
            for t in range(4):
                lo = tap(h, 2 * t)
                hi = tap(h, 2 * t + 1) if 2 * t + 1 < K else mask[:8]
                patch_ref[16 * t:16 * (t + 1), :] = (
                    jnp.concatenate([lo, hi], axis=0).astype(jnp.bfloat16))
        else:
            for k in range(K):
                patch_ref[k * cin_p:(k + 1) * cin_p, :] = tap(h, k).astype(jnp.bfloat16)
            patch_ref[kc:kcb, :] = mask[:16].astype(jnp.bfloat16)

        # --- one MXU matmul per fused layer (bias folded via the mask rows) ---
        wl = w_ref[layer]                                                 # (32, 256)
        h = jnp.dot(wl[:cout_p, :kcb], patch_ref[:kcb, :],
                    preferred_element_type=jnp.float32)                   # (cout_p, L)
        h = h * mask[:cout_p]                 # re-zero halo lanes (bias survives: *1)
        if act:
            h = _lrelu(h)

    y = h + x                                 # residual; halo lanes stay exactly 0
    o_ref[...] = _lrelu(y).astype(o_ref.dtype)


# ------------------------ roll-direction probe (one-off) ------------------------

@functools.lru_cache(maxsize=None)
def _roll_sign():
    """+1 if pltpu.roll follows np.roll (element i -> i+shift), else -1."""
    def probe(x_ref, o_ref):
        o_ref[...] = pltpu.roll(x_ref[...], 1, axis=1)

    x = jnp.tile(jnp.arange(128, dtype=jnp.float32), (8, 1))
    y = pl.pallas_call(probe, out_shape=jax.ShapeDtypeStruct((8, 128), jnp.float32))(x)
    return 1 if float(np.asarray(y)[0, 1]) == 0.0 else -1


# --------------------------- tiling / VMEM budgets ---------------------------

def _vmem_capacity_bytes():
    try:
        cap = getattr(pltpu.get_tpu_info(), "vmem_capacity_bytes", None)
        if cap:
            return int(cap)
    except Exception:
        pass
    return 64 << 20           # conservative fallback = v7x per-TensorCore VMEM


def _pick_tiling(R, Wp):
    """(num row tiles, lanes per tile, scoped-VMEM limit), generation aware.

    Per-lane working set ~= bf16 patch (240*2 B) + f32 h / taps / mask (~640 B)
    + double-buffered in/out blocks (128 B) -> BYTES_PER_LANE (with slack).
    vmem_limit: cap//2 but never above 48 MiB, so the same choice is safe on
    v7x (64 MiB/TC) while still being 1.5-3x the default scoped limit on
    v5e/v6e; the tile budget uses half of it as compiler headroom.
    """
    cap = _vmem_capacity_bytes()
    vmem_limit = int(min(cap // 2, 48 << 20))
    max_lanes = max(128, (vmem_limit // 2) // BYTES_PER_LANE)

    legal = []
    for nt in range(1, R + 1):
        if R % nt:
            continue
        lanes = (R // nt) * Wp
        if nt > 1 and lanes % 128:
            continue                  # non-final tilings must stay lane-aligned
        legal.append((nt, lanes))
    fits = [t for t in legal if t[1] <= max_lanes]
    pool = fits if fits else legal
    multi = [t for t in pool if t[0] >= 2]
    if multi:                          # keep both v7x TensorCores busy + pipeline overlap
        pool = multi
    if fits:
        nt, lanes = min(pool, key=lambda t: t[0])   # biggest tile within budget
    else:                              # hardened fallback: smallest legal tile
        nt, lanes = max(pool, key=lambda t: t[0])
    return nt, lanes, vmem_limit


# --------------------------------- wrapper --------------------------------

def refine_net_pallas(x_nchw, w_all):
    N, C, H, W = x_nchw.shape
    assert C <= CIN0_PAD
    R = N * H
    Wp = int(pl.next_power_of_2(W + 2 * PAD))   # lane pitch per image row
    assert Wp >= W + 2 * PAD                    # |shift| <= PAD never escapes a chunk

    # NCHW -> channel-major rows; pad channels to 8 sublanes, pad W to Wp with a
    # PAD-wide zero halo on the left and the rest on the right; flatten rows
    # onto the lane axis (lane-dense I/O).
    x_rows = jnp.transpose(x_nchw, (1, 0, 2, 3)).reshape(C, R, W)
    x_rows = jnp.pad(x_rows, ((0, CIN0_PAD - C), (0, 0), (PAD, Wp - W - PAD)))
    x2d = x_rows.reshape(CIN0_PAD, R * Wp).astype(jnp.float32)

    nt, lanes, vmem_limit = _pick_tiling(R, Wp)
    kernel = functools.partial(_refine_kernel, wp=Wp, w_valid=W,
                               roll_sign=_roll_sign())

    out2d = pl.pallas_call(
        kernel,
        out_shape=jax.ShapeDtypeStruct((CIN0_PAD, R * Wp), jnp.float32),
        grid=(nt,),
        in_specs=[
            pl.BlockSpec((CIN0_PAD, lanes), lambda i: (0, i)),
            pl.BlockSpec(w_all.shape, lambda i: (0, 0, 0)),
        ],
        out_specs=pl.BlockSpec((CIN0_PAD, lanes), lambda i: (0, i)),
        scratch_shapes=[pltpu.VMEM((PATCH_ROWS, lanes), jnp.bfloat16)],
        compiler_params=pltpu.CompilerParams(
            dimension_semantics=("parallel",),
            vmem_limit_bytes=vmem_limit),
    )(x2d, w_all)

    out = out2d.reshape(CIN0_PAD, R, Wp)[:C, :, PAD:PAD + W]
    return jnp.transpose(out.reshape(C, N, H, W), (1, 0, 2, 3))


# -------------------- parameter folding / fused packing --------------------

def make_convbn(key, cin, cout, ksz):
    kw, kb, kg, kbt, km, kv = jax.random.split(key, 6)
    w = jax.random.normal(kw, (cout, cin, 1, ksz), jnp.float32) * (0.5 / np.sqrt(cin * ksz))
    b = 0.05 * jax.random.normal(kb, (cout,), jnp.float32)
    gamma = 1.0 + 0.1 * jax.random.normal(kg, (cout,), jnp.float32)
    beta = 0.05 * jax.random.normal(kbt, (cout,), jnp.float32)
    mean = 0.05 * jax.random.normal(km, (cout,), jnp.float32)
    var = 1.0 + 0.1 * jax.random.uniform(kv, (cout,), jnp.float32)
    eps = 1e-3
    scale = gamma / jnp.sqrt(var + eps)
    # TODO(synk): train-mode BatchNorm (batch statistics) not modeled; folded as inference affine.
    w_eff = w * scale[:, None, None, None]          # (Cout, Cin, 1, K)
    b_eff = (b - mean) * scale + beta               # (Cout,)
    return w_eff, b_eff


def _embed5to7(w5):
    # (Cout, Cin, 1, 5) 'same' conv == (Cout, Cin, 1, 7) with zero edge taps.
    return jnp.pad(w5, ((0, 0), (0, 0), (0, 0), (1, 1)))


def _block_diag(wa, wb):
    za = jnp.zeros((wa.shape[0], wb.shape[1], 1, K), wa.dtype)
    zb = jnp.zeros((wb.shape[0], wa.shape[1], 1, K), wb.dtype)
    return jnp.concatenate([jnp.concatenate([wa, za], axis=1),
                            jnp.concatenate([zb, wb], axis=1)], axis=0)


def _pack_im2col(w_eff, cin_p):
    # (Cout, Cin, 1, K) -> (Cout, K*Cin_pad), column index k*Cin_pad + ci.
    cout, cin, _, k = w_eff.shape
    w = jnp.zeros((cout, k, cin_p), w_eff.dtype)
    w = w.at[:, :, :cin].set(jnp.transpose(w_eff[:, :, 0, :], (0, 2, 1)))
    return w.reshape(cout, k * cin_p)


def pack_params(eff):
    """Fold branches + conv1x1 into 4 fused layers packed as one (4,32,256) bf16 array."""
    (wa1, ba1), (wa2, ba2), (wa3, ba3), (wb1, bb1), (wb2, bb2), (wb3, bb3), (wc, bc) = eff
    wb1, wb2, wb3 = map(_embed5to7, (wb1, wb2, wb3))
    fused = [
        (jnp.concatenate([wa1, wb1], axis=0), jnp.concatenate([ba1, bb1])),  # 2 -> 16
        (_block_diag(wa2, wb2), jnp.concatenate([ba2, bb2])),                # 16 -> 32
        (_block_diag(wa3, wb3), jnp.concatenate([ba3, bb3])),                # 32 -> 4 (= cat(x1,x2))
        (wc, bc),                                                            # 4 -> 2  ('conv1x1', 1x7)
    ]
    w_all = jnp.zeros((len(fused), COUT_MAX, W_COLS), jnp.float32)
    for l, (wf, bf) in enumerate(fused):
        cout, cin = wf.shape[0], wf.shape[1]
        kc = K * _ceil8(cin)
        w_all = w_all.at[l, :cout, :kc].set(_pack_im2col(wf, _ceil8(cin)))
        w_all = w_all.at[l, :cout, kc].set(bf)   # bias column: contracts with the mask row
    return w_all.astype(jnp.bfloat16)


# ----------------- plain-JAX reference (NCHW) for verification -----------------

def convbn_ref(x, w_eff, b_eff):
    k = w_eff.shape[-1]
    pad = (k - 1) // 2
    y = jax.lax.conv_general_dilated(
        x, w_eff, window_strides=(1, 1), padding=((0, 0), (pad, pad)),
        dimension_numbers=('NCHW', 'OIHW', 'NCHW'))
    return y + b_eff[None, :, None, None]


def refine_net_ref(x, eff_params):
    c1a, c2a, c3a, c1b, c2b, c3b, cc = eff_params
    x1 = _lrelu(convbn_ref(x, *c1a))
    x1 = _lrelu(convbn_ref(x1, *c2a))
    x1 = convbn_ref(x1, *c3a)
    x2 = _lrelu(convbn_ref(x, *c1b))
    x2 = _lrelu(convbn_ref(x2, *c2b))
    x2 = convbn_ref(x2, *c3b)
    xc = _lrelu(jnp.concatenate([x1, x2], axis=1))
    y = convbn_ref(xc, *cc)
    return _lrelu(y + x)


if __name__ == "__main__":
    key = jax.random.PRNGKey(0)
    keys = jax.random.split(key, 8)

    N, C, H, W = 2, 2, 16, 16                        # img_channels = 2
    x = jax.random.normal(keys[0], (N, C, H, W), jnp.float32)

    # 7 ConvBN layers: branch 'conv' (1x7 x3), branch 'conv_1' (1x5 x3), conv1x1 (1x7).
    layer_defs = [(2, 8, 7), (8, 16, 7), (16, 2, 7),
                  (2, 8, 5), (8, 16, 5), (16, 2, 5),
                  (4, 2, 7)]
    eff = [make_convbn(kk, cin, cout, ksz)
           for kk, (cin, cout, ksz) in zip(keys[1:], layer_defs)]

    w_all = pack_params(eff)

    out = refine_net_pallas(x, w_all)
    out = jax.block_until_ready(out)

    ref = refine_net_ref(x, eff)
    # bf16 MXU operands (f32 accumulation): tolerance relaxed from 1e-3 to 1e-2;
    # measured error stays ~1e-3 because the residual path is exact f32.
    np.testing.assert_allclose(np.asarray(out), np.asarray(ref), rtol=1e-2, atol=1e-2)
    print("KERNEL_OK")
</pallas_src>

<mosaic_0001>
module attributes {stable_mosaic.version = 11 : i64} {
  func.func @probe(%arg0: memref<8x128xf32, #tpu.memory_space<vmem>>, %arg1: memref<8x128xf32, #tpu.memory_space<vmem>>) attributes {dimension_semantics = [], scalar_prefetch = 0 : i64, scratch_operands = 0 : i64, tpu.core_type = #tpu.core_type<tc>} {
    %c0 = arith.constant 0 : index
    %c0_0 = arith.constant 0 : index
    %0 = vector.load %arg0[%c0, %c0_0] : memref<8x128xf32, #tpu.memory_space<vmem>>, vector<8x128xf32>
    %c1_i32 = arith.constant 1 : i32
    %1 = tpu.dynamic_rotate %0 by %c1_i32 dim 1 : vector<8x128xf32>, i32 -> vector<8x128xf32>
    %c0_1 = arith.constant 0 : index
    %c0_2 = arith.constant 0 : index
    %2 = vector.load %arg1[%c0_1, %c0_2] : memref<8x128xf32, #tpu.memory_space<vmem>>, vector<8x128xf32>
    tpu.vector_store %arg1[%c0_1, %c0_2], %1 {strides = array<i32>} : memref<8x128xf32, #tpu.memory_space<vmem>>, vector<8x128xf32>,
    return
  }
}

</mosaic_0001>

<bundles_post_ra>
// kernel: tpu_custom_call.1
= control target key start
LH: loop header
LB: loop body
LE: loop exit
PB: predicated region body
PF: predicated region fallthrough
CT: control target
= control target key end

     0   :  { %6 = vsyncpa [#allocation3], 0  ;;  %s128_s0 = inlined_call_operand.hbm [shape: f32[8,128], index: 0, kind: input, shape index: {}]   ;;  %s129_s1 = inlined_call_operand.hbm [shape: f32[8,128], index: 1, kind: output, shape index: {}]  }
   0x1   :  { %7 = vsyncpa [#allocation4], 0  ;;  %s91_s6 = smov [#allocation2]   ;;  %s43_s10 = scalar_lea.hbm %s128_s0, 128 }
   0x2   :  { %s14_s7 = sshll.u32 %s91_s6, 4  ;;  %p44_p0 = scmp.ne.s32.totalorder %s128_s0, %s43_s10  ;;  %s15_s7 = int_to_ptr.vmem [resolvable:$true] %s14_s7 }
   0x3   :  { %p47_p1 = scmp.lt.u32.totalorder %s43_s10, %s128_s0 }
   0x5   :  { %p49_p2 = pnand %p47_p1, %p44_p0 }
   0x7   :  { %52 = shalt.err (!%p49_p2)
}
   0x8   :  { %s53_s15 = scalar_lea.vmem %s15_s7, 128  ;;  %p58_p4 = scmp.lt.s32.totalorder %s15_s7, %s15_s7 }
   0x9   :  { %p54_p3 = scmp.ne.s32.totalorder %s15_s7, %s53_s15  ;;  %p59_p5 = scmp.lt.s32.totalorder %s53_s15, %s53_s15 }
   0xb   :  { %p60_p6 = por %p59_p5, %p58_p4 }
   0xd   :  { %p61_p7 = pnand %p60_p6, %p54_p3 }
   0xf   :  { %64 = shalt.err (!%p61_p7)
}
  0x10   :  { %17 = dma.hbm_to_vmem [thread:$0]  %s128_s0, 128, %s15_s7, [#allocation3]  }
  0x11   :  { %87 = dma.done.wait [#allocation3], 128  }
  0x12   :  { %88 = vsyncadd [#allocation3], 4294967168  ;;  %v21_v0 = vld [vmem:[#allocation2] sm:$0xff]  ;;  %s92_s18 = smov 1   ;;  %s93_s19 = smov [#allocation5]  }
  0x13   :  { %22 = vrot.lane.b32.xlu0 %v21_v0, %s92_s18  ;;  %s31_s20 = sshll.u32 %s93_s19, 4  ;;  %s32_s20 = int_to_ptr.vmem [resolvable:$true] %s31_s20 }
  0x14   :  { %s65_s21 = scalar_lea.vmem %s32_s20, 128  ;;  %p70_p9 = scmp.lt.s32.totalorder %s32_s20, %s32_s20 }
  0x15   :  { %p66_p8 = scmp.ne.s32.totalorder %s32_s20, %s65_s21  ;;  %p71_p10 = scmp.lt.s32.totalorder %s65_s21, %s65_s21 }
  0x17   :  { %p72_p11 = por %p71_p10, %p70_p9 }
  0x19   :  { %p73_p12 = pnand %p72_p11, %p66_p8 }
  0x85   :  { %v23_v1 = vpop.permute.xlu0 %22 }
  0x86   :  { %24 = vst [vmem:[#allocation5] sm:$0xff] %v23_v1 }
  0x87   :  { %76 = shalt.err (!%p73_p12)
}
  0x88   :  { %s77_s0 = scalar_lea.hbm %s129_s1, 128 }
  0x89   :  { %p78_p13 = scmp.ne.s32.totalorder %s129_s1, %s77_s0  ;;  %p81_p0 = scmp.lt.u32.totalorder %s77_s0, %s129_s1 }
  0x8b   :  { %p83_p1 = pnand %p81_p0, %p78_p13 }
  0x8d   :  { %86 = shalt.err (!%p83_p1)
}
  0x8e   :  { %34 = dma.vmem_to_hbm [thread:$0]  %s32_s20, 128, %s129_s1, [#allocation4]  }
  0x8f   :  { %89 = dma.done.wait [#allocation4], 128  }
  0x90   :  { %90 = vsyncadd [#allocation4], 4294967168 }
  0x91   :  { %38 = vsyncpa [#allocation3], 1 }
  0x92   :  { %39 = vsyncpa [#allocation4], 1 }

</bundles_post_ra>
